<compile_context>
chip_gen: v6e
topology: v6e:2x2x1
jax: 0.10.0
libtpu: 0.0.40
codegen_flags: <defaults>
</compile_context>

<pallas_src>
import functools
import math

import jax
import jax.numpy as jnp
from jax.experimental import pallas as pl
from jax.experimental.pallas import tpu as pltpu


def _round_up(a, m):
    return (a + m - 1) // m * m


def _adaptive_relu_kernel(idx_ref, x_ref, w_ref, b_ref, o_ref, *,
                          negative_slope, compute_dtype, weight_resident):
    # idx_ref: scalar-prefetched channel indices in SMEM.
    ch = idx_ref[pl.program_id(0)]
    x = x_ref[0]                                     # (TP, IN), input dtype
    w = w_ref[ch] if weight_resident else w_ref[0]   # (IN, OUT)
    b = b_ref[ch]                                    # (1, OUT)
    if compute_dtype is not None:
        x = x.astype(compute_dtype)                  # in-kernel cast (VPU, hidden under DMA)
        w = w.astype(compute_dtype)
    y = jnp.dot(x, w, preferred_element_type=jnp.float32)
    y = y + b.astype(jnp.float32)
    o_ref[0] = jnp.where(y > 0, y, negative_slope * y).astype(o_ref.dtype)


def adaptive_relu_layer(x, indices, weight, bias, *, tp=None, compute_dtype=None,
                        out_dtype=None, weight_resident=None, negative_slope=0.2):
    """x: (n_sel, P, IN), indices: (n_sel,) int,
       weight: (C, IN, OUT), bias: (C, 1, OUT) -> (n_sel, P, OUT)."""
    n_sel, P, IN = x.shape
    C, IN_w, OUT = weight.shape
    assert IN_w == IN and bias.shape == (C, 1, OUT)

    if out_dtype is None:
        out_dtype = x.dtype
    in_bytes = jnp.dtype(x.dtype).itemsize
    w_bytes = jnp.dtype(weight.dtype).itemsize
    out_bytes = jnp.dtype(out_dtype).itemsize
    b_bytes = jnp.dtype(bias.dtype).itemsize

    # Keep the whole per-network weight table resident in VMEM when it is small
    # (KiloNeRF regime); otherwise gather one channel per n_sel step via scalar prefetch.
    if weight_resident is None:
        weight_resident = (C * IN * OUT * w_bytes) <= (8 << 20)

    # Point-axis tile: as large as a conservative VMEM budget allows for the
    # double-buffered x + out streams, so per-grid-step overhead is amortized and
    # DMAs are large. Sublane alignment depends on the narrowest streamed dtype.
    align = max(8, 32 // min(in_bytes, out_bytes))
    if tp is None:
        bytes_per_row = 2 * (IN * in_bytes + OUT * out_bytes)   # double-buffered x + out
        budget = 24 << 20                                       # safe on v7x (64 MiB phys VMEM)
        tp = max(align, min(budget // bytes_per_row, 1 << 15))
    tp = min(tp, _round_up(P, align))
    tp = max(align, (tp // align) * align)

    grid = (n_sel, pl.cdiv(P, tp))   # ragged trailing P tile handled by Pallas masking

    if weight_resident:
        w_spec = pl.BlockSpec((C, IN, OUT), lambda i, j, idx: (0, 0, 0))
    else:
        w_spec = pl.BlockSpec((1, IN, OUT), lambda i, j, idx: (idx[i], 0, 0))

    grid_spec = pltpu.PrefetchScalarGridSpec(
        num_scalar_prefetch=1,
        grid=grid,
        in_specs=[
            # x: one (TP, IN) tile per (channel-slot, point-tile); streamed, unpadded.
            pl.BlockSpec((1, tp, IN), lambda i, j, idx: (i, j, 0)),
            # weight: resident table or gathered channel (constant across P tiles).
            w_spec,
            # bias: whole (tiny) table resident in VMEM, indexed in-kernel.
            pl.BlockSpec((C, 1, OUT), lambda i, j, idx: (0, 0, 0)),
        ],
        out_specs=pl.BlockSpec((1, tp, OUT), lambda i, j, idx: (i, j, 0)),
    )

    # VMEM estimate (x2 for double-buffering) + headroom; raise the scoped limit so the
    # large tiles compile on v5e/v6e default limits while staying well under v7x's 64 MiB.
    est = 2 * (tp * IN * in_bytes + tp * OUT * out_bytes
               + (C if weight_resident else 1) * IN * OUT * w_bytes
               + C * OUT * b_bytes)
    vmem_limit = max(int(1.5 * est) + (2 << 20), 16 << 20)

    out = pl.pallas_call(
        functools.partial(_adaptive_relu_kernel,
                          negative_slope=negative_slope,
                          compute_dtype=compute_dtype,
                          weight_resident=weight_resident),
        out_shape=jax.ShapeDtypeStruct((n_sel, P, OUT), out_dtype),
        grid_spec=grid_spec,
        compiler_params=pltpu.CompilerParams(
            # No reduction axis: both grid axes are independent -> shard both across
            # v7x's 2 TensorCores even when n_sel is small.
            dimension_semantics=("parallel", "parallel"),
            vmem_limit_bytes=vmem_limit,
        ),
    )(indices.astype(jnp.int32), x, weight, bias)
    return out


def init_params(key, n_channels, in_features, out_features):
    # torch.nn.init.kaiming_uniform_ defaults: a=0, fan_in mode, leaky_relu -> gain=sqrt(2).
    # For a 3D tensor torch computes fan_in = size(1) * prod(sizes[2:]) = IN * OUT.
    fan_in = in_features * out_features
    gain = math.sqrt(2.0)
    bound = gain * math.sqrt(3.0 / fan_in)
    weight = jax.random.uniform(
        key, (n_channels, in_features, out_features),
        minval=-bound, maxval=bound, dtype=jnp.float32)
    bias = jnp.zeros((n_channels, 1, out_features), dtype=jnp.float32)
    return weight, bias


def reference(x, indices, weight, bias, negative_slope=0.2):
    y = jnp.einsum("bpi,bio->bpo", x, weight[indices]) + bias[indices]
    return jnp.where(y > 0, y, negative_slope * y)


if __name__ == "__main__":
    key = jax.random.PRNGKey(0)
    k_w, k_x, k_i, k_b = jax.random.split(key, 4)

    n_channels = 8       # channel_size in AdaptiveLinearWithChannel
    in_features = 32
    out_features = 32
    n_points = 250       # NOT a multiple of the tile -> exercises the ragged trailing tile
    n_sel = 4            # number of selected channels (len(indices))

    weight, bias = init_params(k_w, n_channels, in_features, out_features)
    # The module inits bias to zeros; use a small random bias here so the bias add is tested.
    bias = 0.1 * jax.random.normal(k_b, (n_channels, 1, out_features), dtype=jnp.float32)
    x = jax.random.normal(k_x, (n_sel, n_points, in_features), dtype=jnp.float32)
    indices = jax.random.randint(k_i, (n_sel,), 0, n_channels, dtype=jnp.int32)

    ref = reference(x, indices, weight, bias)

    # Path 1: defaults (resident weight table, auto tile size).
    out1 = jax.block_until_ready(adaptive_relu_layer(x, indices, weight, bias))
    # Path 2: per-channel weight gather + small explicit tile (ragged trailing P tile).
    out2 = jax.block_until_ready(
        adaptive_relu_layer(x, indices, weight, bias, tp=64, weight_resident=False))

    assert out1.shape == (n_sel, n_points, out_features)
    assert out2.shape == (n_sel, n_points, out_features)
    # f32 compute both sides; tolerance covers MXU default-precision rounding only.
    assert jnp.allclose(out1, ref, atol=5e-3, rtol=5e-3), "mismatch vs reference (resident path)"
    assert jnp.allclose(out2, ref, atol=5e-3, rtol=5e-3), "mismatch vs reference (gather path)"

    print("KERNEL_OK")
</pallas_src>

<mosaic_0001>
module attributes {stable_mosaic.version = 11 : i64} {
  func.func @_adaptive_relu_kernel(%arg0: i32, %arg1: i32, %arg2: memref<4xi32, #tpu.memory_space<smem>>, %arg3: memref<1x256x32xf32, #tpu.memory_space<vmem>>, %arg4: memref<8x32x32xf32, #tpu.memory_space<vmem>>, %arg5: memref<8x1x32xf32, #tpu.memory_space<vmem>>, %arg6: memref<1x256x32xf32, #tpu.memory_space<vmem>>) attributes {dimension_semantics = [#tpu.dimension_semantics<parallel>, #tpu.dimension_semantics<parallel>], iteration_bounds = array<i64: 4, 1>, scalar_prefetch = 1 : i64, scratch_operands = 0 : i64, tpu.core_type = #tpu.core_type<tc>, window_params = [{transform_indices = @transform_0, window_bounds = array<i64: 1, 256, 32>}, {pipeline_mode = #tpu.pipeline_mode<synchronous>, transform_indices = @transform_1, window_bounds = array<i64: 8, 32, 32>}, {pipeline_mode = #tpu.pipeline_mode<synchronous>, transform_indices = @transform_2, window_bounds = array<i64: 8, 1, 32>}, {transform_indices = @transform_3, window_bounds = array<i64: 1, 256, 32>}]} {
    %0 = arith.index_cast %arg0 : i32 to index
    %1 = memref.load %arg2[%0] : memref<4xi32, #tpu.memory_space<smem>>
    %c0 = arith.constant 0 : index
    %c0_0 = arith.constant 0 : index
    %c0_1 = arith.constant 0 : index
    %2 = vector.load %arg3[%c0, %c0_0, %c0_1] : memref<1x256x32xf32, #tpu.memory_space<vmem>>, vector<1x256x32xf32>
    %3 = vector.shape_cast %2 : vector<1x256x32xf32> to vector<256x32xf32>
    %4 = arith.index_cast %1 : i32 to index
    %c0_2 = arith.constant 0 : index
    %c0_3 = arith.constant 0 : index
    %5 = vector.load %arg4[%4, %c0_2, %c0_3] : memref<8x32x32xf32, #tpu.memory_space<vmem>>, vector<1x32x32xf32>
    %6 = vector.shape_cast %5 : vector<1x32x32xf32> to vector<32x32xf32>
    %7 = arith.index_cast %1 : i32 to index
    %c0_4 = arith.constant 0 : index
    %c0_5 = arith.constant 0 : index
    %8 = vector.load %arg5[%7, %c0_4, %c0_5] : memref<8x1x32xf32, #tpu.memory_space<vmem>>, vector<1x1x32xf32>
    %9 = vector.shape_cast %8 : vector<1x1x32xf32> to vector<1x32xf32>
    %cst = arith.constant dense<0.000000e+00> : vector<256x32xf32>
    %10 = tpu.matmul %3, %6, %cst {dimension_numbers = #tpu.dot_dimension_numbers<[1], [0], [0], [1], [0, 0, 1, 1], [], []>} : vector<256x32xf32>, vector<32x32xf32>, vector<256x32xf32> -> vector<256x32xf32>
    %11 = vector.broadcast %9 : vector<1x32xf32> to vector<256x32xf32>
    %12 = arith.addf %10, %11 : vector<256x32xf32>
    %cst_6 = arith.constant 0.000000e+00 : f32
    %13 = vector.broadcast %cst_6 : f32 to vector<256x32xf32>
    %14 = arith.cmpf ogt, %12, %13 : vector<256x32xf32>
    %cst_7 = arith.constant 2.000000e-01 : f32
    %15 = vector.broadcast %cst_7 : f32 to vector<256x32xf32>
    %16 = arith.mulf %15, %12 : vector<256x32xf32>
    %17 = arith.select %14, %12, %16 : vector<256x32xi1>, vector<256x32xf32>
    %c0_8 = arith.constant 0 : index
    %c0_9 = arith.constant 0 : index
    %c0_10 = arith.constant 0 : index
    %18 = vector.load %arg6[%c0_8, %c0_9, %c0_10] : memref<1x256x32xf32, #tpu.memory_space<vmem>>, vector<1x256x32xf32>
    %19 = vector.shape_cast %18 : vector<1x256x32xf32> to vector<256x32xf32>
    %20 = vector.shape_cast %17 : vector<256x32xf32> to vector<1x256x32xf32>
    tpu.vector_store %arg6[%c0_8, %c0_9, %c0_10], %20 {strides = array<i32>} : memref<1x256x32xf32, #tpu.memory_space<vmem>>, vector<1x256x32xf32>,
    return
  }
  func.func @transform_0(%arg0: i32, %arg1: i32, %arg2: memref<4xi32, #tpu.memory_space<smem>>) -> (i32, i32, i32) {
    %c0_i32 = arith.constant 0 : i32
    %c0_i32_0 = arith.constant 0 : i32
    return %arg0, %arg1, %c0_i32 : i32, i32, i32
  }
  func.func @transform_1(%arg0: i32, %arg1: i32, %arg2: memref<4xi32, #tpu.memory_space<smem>>) -> (i32, i32, i32) {
    %c0_i32 = arith.constant 0 : i32
    %c0_i32_0 = arith.constant 0 : i32
    %c0_i32_1 = arith.constant 0 : i32
    %c0_i32_2 = arith.constant 0 : i32
    return %c0_i32, %c0_i32_0, %c0_i32_1 : i32, i32, i32
  }
  func.func @transform_2(%arg0: i32, %arg1: i32, %arg2: memref<4xi32, #tpu.memory_space<smem>>) -> (i32, i32, i32) {
    %c0_i32 = arith.constant 0 : i32
    %c0_i32_0 = arith.constant 0 : i32
    %c0_i32_1 = arith.constant 0 : i32
    %c0_i32_2 = arith.constant 0 : i32
    return %c0_i32, %c0_i32_0, %c0_i32_1 : i32, i32, i32
  }
  func.func @transform_3(%arg0: i32, %arg1: i32, %arg2: memref<4xi32, #tpu.memory_space<smem>>) -> (i32, i32, i32) {
    %c0_i32 = arith.constant 0 : i32
    %c0_i32_0 = arith.constant 0 : i32
    return %arg0, %arg1, %c0_i32 : i32, i32, i32
  }
}

</mosaic_0001>

<bundles_post_ra>
// kernel: tpu_custom_call.1
= control target key start
LH: loop header
LB: loop body
LE: loop exit
PB: predicated region body
PF: predicated region fallthrough
CT: control target
= control target key end

     0   :  { %s1259_s0 = inlined_call_operand.vmem [shape: s32[4], index: 0, kind: input, shape index: {}]   ;;  %s1260_s1 = inlined_call_operand.vmem [shape: f32[4,250,32], index: 1, kind: input, shape index: {}]   ;;  %s1261_s2 = inlined_call_operand.vmem [shape: f32[8,32,32], index: 2, kind: input, shape index: {}]   ;;  %s1262_s3 = inlined_call_operand.vmem [shape: f32[8,1,32], index: 3, kind: input, shape index: {}]   ;;  %s1263_s4 = inlined_call_operand.vmem [shape: f32[4,250,32], index: 4, kind: output, shape index: {}]  }
   0x1   :  { %s9_s17 = sshll.u32 %s1259_s0, 4  ;;  %s10_s17 = int_to_ptr.vmem [resolvable:$true] %s9_s17 }
   0x2   :  { %s976_s18 = scalar_lea.vmem %s10_s17, 16  ;;  %p981_p1 = scmp.lt.s32.totalorder %s10_s17, %s10_s17 }
   0x3   :  { %p977_p0 = scmp.ne.s32.totalorder %s10_s17, %s976_s18  ;;  %p982_p2 = scmp.lt.s32.totalorder %s976_s18, %s976_s18 }
   0x5   :  { %p983_p3 = por %p982_p2, %p981_p1 }
   0x7   :  { %p984_p4 = pnand %p983_p3, %p977_p0 }
   0x9   :  { %987 = shalt.err (!%p984_p4)  }
   0xa   :  { %s1014_s19 = smov [#allocation3]  }
   0xb   :  { %12 = dma.vmem_to_smem %s10_s17, 16, %s1014_s19, [#allocation2] }
   0xc   :  { %1000 = dma.done.wait [#allocation2], 16 }
   0xd   :  { %1001 = vsyncadd [#allocation2], 4294967280 }
   0xe   :  { %14 = sfence }
   0xf   :  { %s1043_s20 = smov 0   ;;  %s1045_s21 = smov 0  }
  0x10   :  { %s1047_s22 = smov 0  }
  0x11 LB: > { %s32_s0 = sadd.s32 1, %s1008_s21  ;;  %p808_p5 = scmp.ge.s32.totalorder %s1012_s22, 1  ;;  %s1012_s22 = sphi %s1047_s22, %s20_s22   ;;  %s1008_s21 = sphi %s1045_s21, %s1265_s21   ;;  %s1004_s20 = sphi %s1043_s20, %s1264_s20  }
  0x12   : > { %p34_p6 = scmp.ge.s32.totalorder %s32_s0, 4  ;;  %p165_p7 = scmp.lt.s32.totalorder %s1012_s22, 5 }
  0x14   : > { %s1267_s0 = smov (%p34_p6, %s32_s0), 0  ;;  %p166_p8 = pnand %p808_p5, %p165_p7 }
  0x15   : > { %s1061_s23 = sld [smem:[#allocation3 + %s1004_s20]] (!%p166_p8)  ;;  %p198_p9 = scmp.lt.s32.totalorder (!%p166_p8), %s1004_s20, 3 }
  0x16   : > { %169 = sbr.rel (%p166_p8) target bundleno = 269 (0x10d), region = 32 }
  0x1b   : > { %s1269_s20 = smov (!%p198_p9, %s1004_s20), 3  ;;  %vm264_vm0 = vcmask 261120   ;;  %s813_s28 = sshll.u32 %s1061_s23, 5 }
  0x1c   : > { %s849_s24 = sshll.u32 %s1269_s20, 8  ;;  %s251_s5 = scalar_lea.vmem %s1261_s2, %s813_s28 }
  0x1d   : > { %s1071_s27 = scalar_lea.vmem %s1260_s1, %s849_s24  ;;  %v255_v2 = vld [vmem:[%s251_s5 + $0x18] sm:$0xff]  ;;  %v254_v3 = vld [vmem:[%s251_s5 + $0x10] sm:$0xff]  ;;  %v253_v4 = vld [vmem:[%s251_s5 + $0x8] sm:$0xff]  ;;  %s256_s8 = scalar_lea.vmem %s1262_s3, %s1061_s23 }
  0x1e   : > { %v218_v0 = vld [vmem:[%s1071_s27] sm:$0xff]  ;;  %887 = vmatprep.subr.mxu0 %v255_v2  ;;  %943 = vmatprep.subr.mxu1 %v255_v2  ;;  %v219_v6 = vld [vmem:[%s1071_s27 + $0x8] sm:$0xff]  ;;  %v220_v8 = vld [vmem:[%s1071_s27 + $0x10] sm:$0xff]  ;;  %s1154_s11 = scalar_lea.vmem %s1263_s4, %s849_s24 }
  0x1f   : > { %v234_v1 = vld [vmem:[%s1071_s27 + $0x80] sm:$0xff]  ;;  %895 = vmatprep.mubr.msk.f32.mxu0 %vm264_vm0, %v218_v0  ;;  %888 = vmatpush3.msra.mxu0 %v255_v2  ;;  %v235_v7 = vld [vmem:[%s1071_s27 + $0x88] sm:$0xff]  ;;  %v236_v9 = vld [vmem:[%s1071_s27 + $0x90] sm:$0xff] }
  0x20   : > { %919 = vmatprep.mubr.msk.f32.mxu1 %vm264_vm0, %v234_v1  ;;  %947 = vmatpush3.msra.mxu1 %v255_v2  ;;  %v252_v5 = vld [vmem:[%s251_s5] sm:$0xff]  ;;  %v221_v10 = vld [vmem:[%s1071_s27 + $0x18] sm:$0xff]  ;;  %v223_v14 = vld [vmem:[%s1071_s27 + $0x28] sm:$0xff] }
  0x21   : > { %889 = vmatprep.subr.mxu0 %v254_v3  ;;  %944 = vmatprep.subr.mxu1 %v254_v3  ;;  %v237_v11 = vld [vmem:[%s1071_s27 + $0x98] sm:$0xff]  ;;  %v222_v12 = vld [vmem:[%s1071_s27 + $0x20] sm:$0xff]  ;;  %v239_v15 = vld [vmem:[%s1071_s27 + $0xa8] sm:$0xff] }
  0x22   : > { %890 = vmatpush3.msra.mxu0 %v254_v3  ;;  %948 = vmatpush3.msra.mxu1 %v254_v3  ;;  %v238_v13 = vld [vmem:[%s1071_s27 + $0xa0] sm:$0xff]  ;;  %v224_v16 = vld [vmem:[%s1071_s27 + $0x30] sm:$0xff]  ;;  %v225_v18 = vld [vmem:[%s1071_s27 + $0x38] sm:$0xff] }
  0x23   : > { %891 = vmatprep.subr.mxu0 %v253_v4  ;;  %945 = vmatprep.subr.mxu1 %v253_v4  ;;  %v240_v17 = vld [vmem:[%s1071_s27 + $0xb0] sm:$0xff]  ;;  %v241_v19 = vld [vmem:[%s1071_s27 + $0xb8] sm:$0xff]  ;;  %v226_v20 = vld [vmem:[%s1071_s27 + $0x40] sm:$0xff] }
  0x24   : > { %892 = vmatpush3.msra.mxu0 %v253_v4  ;;  %949 = vmatpush3.msra.mxu1 %v253_v4  ;;  %v242_v21 = vld [vmem:[%s1071_s27 + $0xc0] sm:$0xff]  ;;  %v227_v22 = vld [vmem:[%s1071_s27 + $0x48] sm:$0xff]  ;;  %v228_v24 = vld [vmem:[%s1071_s27 + $0x50] sm:$0xff] }
  0x25   : > { %893 = vmatprep.subr.mxu0 %v252_v5  ;;  %946 = vmatprep.subr.mxu1 %v252_v5  ;;  %v243_v23 = vld [vmem:[%s1071_s27 + $0xc8] sm:$0xff]  ;;  %v244_v25 = vld [vmem:[%s1071_s27 + $0xd0] sm:$0xff]  ;;  %v229_v26 = vld [vmem:[%s1071_s27 + $0x58] sm:$0xff] }
  0x26   : > { %894 = vmatpush3.msra.mxu0 %v252_v5  ;;  %950 = vmatpush3.msra.mxu1 %v252_v5  ;;  %v245_v27 = vld [vmem:[%s1071_s27 + $0xd8] sm:$0xff]  ;;  %v230_v28 = vld [vmem:[%s1071_s27 + $0x60] sm:$0xff]  ;;  %v231_v30 = vld [vmem:[%s1071_s27 + $0x68] sm:$0xff] }
  0x27   : > { %896 = vmatmul.mubr.msk.f32.vlgmr.msra.gmra.mxu0 %vm264_vm0, %v219_v6  ;;  %920 = vmatmul.mubr.msk.f32.vlgmr.msra.gmra.mxu1 %vm264_vm0, %v235_v7  ;;  %v246_v29 = vld [vmem:[%s1071_s27 + $0xe0] sm:$0xff]  ;;  %v247_v31 = vld [vmem:[%s1071_s27 + $0xe8] sm:$0xff]  ;;  %v232_v32 = vld [vmem:[%s1071_s27 + $0x70] sm:$0xff] }
  0x28   : > { %898 = vmatprep.mubr.msk.f32.mxu0 %vm264_vm0, %v220_v8  ;;  %922 = vmatprep.mubr.msk.f32.mxu1 %vm264_vm0, %v236_v9  ;;  %v248_v33 = vld [vmem:[%s1071_s27 + $0xf0] sm:$0xff]  ;;  %v233_v34 = vld [vmem:[%s1071_s27 + $0x78] sm:$0xff]  ;;  %v1145_v36 = vld [vmem:[%s256_s8] ss:$0 sm:$0xff] }
  0x29   : > { %v249_v35 = vld [vmem:[%s1071_s27 + $0xf8] sm:$0xff] }
  0x2b   : > { %899 = vmatmul.mubr.msk.f32.gmra.mxu0 %vm264_vm0, %v221_v10  ;;  %923 = vmatmul.mubr.msk.f32.gmra.mxu1 %vm264_vm0, %v237_v11 }
  0x2c   : > { %901 = vmatprep.mubr.msk.f32.mxu0 %vm264_vm0, %v222_v12  ;;  %925 = vmatprep.mubr.msk.f32.mxu1 %vm264_vm0, %v238_v13 }
  0x2f   : > { %902 = vmatmul.mubr.msk.f32.gmra.mxu0 %vm264_vm0, %v223_v14  ;;  %926 = vmatmul.mubr.msk.f32.gmra.mxu1 %vm264_vm0, %v239_v15 }
  0x30   : > { %904 = vmatprep.mubr.msk.f32.mxu0 %vm264_vm0, %v224_v16  ;;  %928 = vmatprep.mubr.msk.f32.mxu1 %vm264_vm0, %v240_v17 }
  0x33   : > { %905 = vmatmul.mubr.msk.f32.gmra.mxu0 %vm264_vm0, %v225_v18  ;;  %929 = vmatmul.mubr.msk.f32.gmra.mxu1 %vm264_vm0, %v241_v19 }
  0x34   : > { %907 = vmatprep.mubr.msk.f32.mxu0 %vm264_vm0, %v226_v20  ;;  %931 = vmatprep.mubr.msk.f32.mxu1 %vm264_vm0, %v242_v21 }
  0x37   : > { %908 = vmatmul.mubr.msk.f32.gmra.mxu0 %vm264_vm0, %v227_v22  ;;  %932 = vmatmul.mubr.msk.f32.gmra.mxu1 %vm264_vm0, %v243_v23 }
  0x38   : > { %910 = vmatprep.mubr.msk.f32.mxu0 %vm264_vm0, %v228_v24  ;;  %934 = vmatprep.mubr.msk.f32.mxu1 %vm264_vm0, %v244_v25 }
  0x3b   : > { %911 = vmatmul.mubr.msk.f32.gmra.mxu0 %vm264_vm0, %v229_v26  ;;  %935 = vmatmul.mubr.msk.f32.gmra.mxu1 %vm264_vm0, %v245_v27 }
  0x3c   : > { %913 = vmatprep.mubr.msk.f32.mxu0 %vm264_vm0, %v230_v28  ;;  %937 = vmatprep.mubr.msk.f32.mxu1 %vm264_vm0, %v246_v29 }
  0x3f   : > { %914 = vmatmul.mubr.msk.f32.gmra.mxu0 %vm264_vm0, %v231_v30  ;;  %938 = vmatmul.mubr.msk.f32.gmra.mxu1 %vm264_vm0, %v247_v31 }
  0x40   : > { %916 = vmatprep.mubr.msk.f32.mxu0 %vm264_vm0, %v232_v32  ;;  %940 = vmatprep.mubr.msk.f32.mxu1 %vm264_vm0, %v248_v33 }
  0x43   : > { %917 = vmatmul.mubr.msk.f32.gmra.mxu0 %vm264_vm0, %v233_v34  ;;  %941 = vmatmul.mubr.msk.f32.gmra.mxu1 %vm264_vm0, %v249_v35 }
  0xe7   : > { %v897_v37 = vpop.f32.mrf.mxu0  ;;  %v921_v38 = vpop.f32.mrf.mxu1 }
  0xe8   : > { %v433_v39 = vadd.f32 %v897_v37, %v1145_v36  ;;  %v513_v40 = vadd.f32 %v921_v38, %v1145_v36 }
  0xe9   : > { %v427_v41 = vpop.f32.mrf.mxu0  ;;  %v507_v42 = vpop.f32.mrf.mxu1 }
  0xea   : > { %vm587_vm1 = vcmp.gt.f32.partialorder %v433_v39, 0.0  ;;  %v619_v43 = vmul.f32 0.2, %v433_v39  ;;  %vm603_vm2 = vcmp.gt.f32.partialorder %v513_v40, 0.0  ;;  %v635_v44 = vmul.f32 0.2, %v513_v40 }
  0xeb   : > { %v428_v45 = vadd.f32 %v1145_v36, %v427_v41  ;;  %v508_v46 = vadd.f32 %v1145_v36, %v507_v42  ;;  %v900_v47 = vpop.f32.mrf.mxu0  ;;  %v924_v48 = vpop.f32.mrf.mxu1 }
  0xec   : > { %v651_v49 = vsel %vm587_vm1, %v433_v39, %v619_v43  ;;  %v667_v50 = vsel %vm603_vm2, %v513_v40, %v635_v44  ;;  %v443_v51 = vadd.f32 %v900_v47, %v1145_v36  ;;  %v523_v52 = vadd.f32 %v924_v48, %v1145_v36 }
  0xed   : > { %683 = vst.msk [vmem:[%s1154_s11 + $0x8] sm:$0xff] %vm264_vm0, %v651_v49  ;;  %699 = vst.msk [vmem:[%s1154_s11 + $0x88] sm:$0xff] %vm264_vm0, %v667_v50  ;;  %vm586_vm3 = vcmp.gt.f32.partialorder %v428_v45, 0.0  ;;  %v618_v53 = vmul.f32 0.2, %v428_v45  ;;  %vm602_vm4 = vcmp.gt.f32.partialorder %v508_v46, 0.0  ;;  %v437_v55 = vpop.f32.mrf.mxu0  ;;  %v517_v56 = vpop.f32.mrf.mxu1 }
  0xee   : > { %v634_v54 = vmul.f32 0.2, %v508_v46  ;;  %vm589_vm5 = vcmp.gt.f32.partialorder %v443_v51, 0.0  ;;  %v621_v57 = vmul.f32 0.2, %v443_v51  ;;  %vm605_vm6 = vcmp.gt.f32.partialorder %v523_v52, 0.0 }
  0xef   : > { %v637_v58 = vmul.f32 0.2, %v523_v52  ;;  %v650_v59 = vsel %vm586_vm3, %v428_v45, %v618_v53  ;;  %v438_v61 = vadd.f32 %v1145_v36, %v437_v55  ;;  %v518_v62 = vadd.f32 %v1145_v36, %v517_v56  ;;  %v903_v63 = vpop.f32.mrf.mxu0  ;;  %v927_v0 = vpop.f32.mrf.mxu1 }
  0xf0   : > { %v666_v60 = vsel %vm602_vm4, %v508_v46, %v634_v54  ;;  %682 = vst.msk [vmem:[%s1154_s11] sm:$0xff] %vm264_vm0, %v650_v59  ;;  %v653_v1 = vsel %vm589_vm5, %v443_v51, %v621_v57  ;;  %v453_v3 = vadd.f32 %v903_v63, %v1145_v36  ;;  %v533_v4 = vadd.f32 %v927_v0, %v1145_v36 }
  0xf1   : > { %698 = vst.msk [vmem:[%s1154_s11 + $0x80] sm:$0xff] %vm264_vm0, %v666_v60  ;;  %v669_v2 = vsel %vm605_vm6, %v523_v52, %v637_v58  ;;  %685 = vst.msk [vmem:[%s1154_s11 + $0x18] sm:$0xff] %vm264_vm0, %v653_v1  ;;  %vm588_vm7 = vcmp.gt.f32.partialorder %v438_v61, 0.0  ;;  %v620_v5 = vmul.f32 0.2, %v438_v61  ;;  %vm604_vm8 = vcmp.gt.f32.partialorder %v518_v62, 0.0  ;;  %v447_v7 = vpop.f32.mrf.mxu0  ;;  %v527_v8 = vpop.f32.mrf.mxu1 }
  0xf2   : > { %701 = vst.msk [vmem:[%s1154_s11 + $0x98] sm:$0xff] %vm264_vm0, %v669_v2  ;;  %v636_v6 = vmul.f32 0.2, %v518_v62  ;;  %vm591_vm9 = vcmp.gt.f32.partialorder %v453_v3, 0.0  ;;  %v623_v9 = vmul.f32 0.2, %v453_v3  ;;  %v448_v13 = vadd.f32 %v1145_v36, %v447_v7 }
  0xf3   : > { %vm607_vm10 = vcmp.gt.f32.partialorder %v533_v4, 0.0  ;;  %v639_v10 = vmul.f32 0.2, %v533_v4  ;;  %v652_v11 = vsel %vm588_vm7, %v438_v61, %v620_v5  ;;  %v528_v14 = vadd.f32 %v1145_v36, %v527_v8  ;;  %v906_v15 = vpop.f32.mrf.mxu0  ;;  %v930_v16 = vpop.f32.mrf.mxu1 }
  0xf4   : > { %v668_v12 = vsel %vm604_vm8, %v518_v62, %v636_v6  ;;  %684 = vst.msk [vmem:[%s1154_s11 + $0x10] sm:$0xff] %vm264_vm0, %v652_v11  ;;  %v655_v17 = vsel %vm591_vm9, %v453_v3, %v623_v9  ;;  %v463_v19 = vadd.f32 %v906_v15, %v1145_v36  ;;  %v543_v20 = vadd.f32 %v930_v16, %v1145_v36 }
  0xf5   : > { %700 = vst.msk [vmem:[%s1154_s11 + $0x90] sm:$0xff] %vm264_vm0, %v668_v12  ;;  %v671_v18 = vsel %vm607_vm10, %v533_v4, %v639_v10  ;;  %687 = vst.msk [vmem:[%s1154_s11 + $0x28] sm:$0xff] %vm264_vm0, %v655_v17  ;;  %vm590_vm11 = vcmp.gt.f32.partialorder %v448_v13, 0.0  ;;  %v622_v21 = vmul.f32 0.2, %v448_v13  ;;  %vm606_vm12 = vcmp.gt.f32.partialorder %v528_v14, 0.0  ;;  %v457_v23 = vpop.f32.mrf.mxu0  ;;  %v537_v24 = vpop.f32.mrf.mxu1 }
  0xf6   : > { %703 = vst.msk [vmem:[%s1154_s11 + $0xa8] sm:$0xff] %vm264_vm0, %v671_v18  ;;  %v638_v22 = vmul.f32 0.2, %v528_v14  ;;  %vm593_vm13 = vcmp.gt.f32.partialorder %v463_v19, 0.0  ;;  %v625_v25 = vmul.f32 0.2, %v463_v19  ;;  %v458_v29 = vadd.f32 %v1145_v36, %v457_v23 }
  0xf7   : > { %vm609_vm14 = vcmp.gt.f32.partialorder %v543_v20, 0.0  ;;  %v641_v26 = vmul.f32 0.2, %v543_v20  ;;  %v654_v27 = vsel %vm590_vm11, %v448_v13, %v622_v21  ;;  %v538_v30 = vadd.f32 %v1145_v36, %v537_v24  ;;  %v909_v31 = vpop.f32.mrf.mxu0  ;;  %v933_v32 = vpop.f32.mrf.mxu1 }
  0xf8   : > { %v670_v28 = vsel %vm606_vm12, %v528_v14, %v638_v22  ;;  %686 = vst.msk [vmem:[%s1154_s11 + $0x20] sm:$0xff] %vm264_vm0, %v654_v27  ;;  %v657_v33 = vsel %vm593_vm13, %v463_v19, %v625_v25  ;;  %v473_v35 = vadd.f32 %v909_v31, %v1145_v36  ;;  %v553_v37 = vadd.f32 %v933_v32, %v1145_v36 }
  0xf9   : > { %702 = vst.msk [vmem:[%s1154_s11 + $0xa0] sm:$0xff] %vm264_vm0, %v670_v28  ;;  %v673_v34 = vsel %vm609_vm14, %v543_v20, %v641_v26  ;;  %689 = vst.msk [vmem:[%s1154_s11 + $0x38] sm:$0xff] %vm264_vm0, %v657_v33  ;;  %vm592_vm15 = vcmp.gt.f32.partialorder %v458_v29, 0.0  ;;  %v624_v38 = vmul.f32 0.2, %v458_v29  ;;  %vm608_vm1 = vcmp.gt.f32.partialorder %v538_v30, 0.0  ;;  %v467_v40 = vpop.f32.mrf.mxu0  ;;  %v547_v41 = vpop.f32.mrf.mxu1 }
  0xfa   : > { %705 = vst.msk [vmem:[%s1154_s11 + $0xb8] sm:$0xff] %vm264_vm0, %v673_v34  ;;  %v640_v39 = vmul.f32 0.2, %v538_v30  ;;  %vm595_vm2 = vcmp.gt.f32.partialorder %v473_v35, 0.0  ;;  %v627_v42 = vmul.f32 0.2, %v473_v35  ;;  %v468_v46 = vadd.f32 %v1145_v36, %v467_v40 }
  0xfb   : > { %vm611_vm3 = vcmp.gt.f32.partialorder %v553_v37, 0.0  ;;  %v643_v43 = vmul.f32 0.2, %v553_v37  ;;  %v656_v44 = vsel %vm592_vm15, %v458_v29, %v624_v38  ;;  %v548_v47 = vadd.f32 %v1145_v36, %v547_v41  ;;  %v912_v48 = vpop.f32.mrf.mxu0  ;;  %v936_v49 = vpop.f32.mrf.mxu1 }
  0xfc   : > { %v672_v45 = vsel %vm608_vm1, %v538_v30, %v640_v39  ;;  %688 = vst.msk [vmem:[%s1154_s11 + $0x30] sm:$0xff] %vm264_vm0, %v656_v44  ;;  %v659_v50 = vsel %vm595_vm2, %v473_v35, %v627_v42  ;;  %v483_v52 = vadd.f32 %v912_v48, %v1145_v36  ;;  %v563_v53 = vadd.f32 %v936_v49, %v1145_v36 }
  0xfd   : > { %704 = vst.msk [vmem:[%s1154_s11 + $0xb0] sm:$0xff] %vm264_vm0, %v672_v45  ;;  %v675_v51 = vsel %vm611_vm3, %v553_v37, %v643_v43  ;;  %691 = vst.msk [vmem:[%s1154_s11 + $0x48] sm:$0xff] %vm264_vm0, %v659_v50  ;;  %vm594_vm4 = vcmp.gt.f32.partialorder %v468_v46, 0.0  ;;  %v626_v54 = vmul.f32 0.2, %v468_v46  ;;  %vm610_vm5 = vcmp.gt.f32.partialorder %v548_v47, 0.0  ;;  %v477_v56 = vpop.f32.mrf.mxu0  ;;  %v557_v57 = vpop.f32.mrf.mxu1 }
  0xfe   : > { %707 = vst.msk [vmem:[%s1154_s11 + $0xc8] sm:$0xff] %vm264_vm0, %v675_v51  ;;  %v642_v55 = vmul.f32 0.2, %v548_v47  ;;  %vm597_vm6 = vcmp.gt.f32.partialorder %v483_v52, 0.0  ;;  %v629_v58 = vmul.f32 0.2, %v483_v52  ;;  %v478_v62 = vadd.f32 %v1145_v36, %v477_v56 }
  0xff   : > { %vm613_vm7 = vcmp.gt.f32.partialorder %v563_v53, 0.0  ;;  %v645_v59 = vmul.f32 0.2, %v563_v53  ;;  %v658_v60 = vsel %vm594_vm4, %v468_v46, %v626_v54  ;;  %v558_v63 = vadd.f32 %v1145_v36, %v557_v57  ;;  %v915_v0 = vpop.f32.mrf.mxu0  ;;  %v939_v1 = vpop.f32.mrf.mxu1 }
 0x100   : > { %v674_v61 = vsel %vm610_vm5, %v548_v47, %v642_v55  ;;  %690 = vst.msk [vmem:[%s1154_s11 + $0x40] sm:$0xff] %vm264_vm0, %v658_v60  ;;  %v661_v2 = vsel %vm597_vm6, %v483_v52, %v629_v58  ;;  %v493_v4 = vadd.f32 %v915_v0, %v1145_v36  ;;  %v573_v5 = vadd.f32 %v939_v1, %v1145_v36 }
 0x101   : > { %706 = vst.msk [vmem:[%s1154_s11 + $0xc0] sm:$0xff] %vm264_vm0, %v674_v61  ;;  %v677_v3 = vsel %vm613_vm7, %v563_v53, %v645_v59  ;;  %693 = vst.msk [vmem:[%s1154_s11 + $0x58] sm:$0xff] %vm264_vm0, %v661_v2  ;;  %vm596_vm8 = vcmp.gt.f32.partialorder %v478_v62, 0.0  ;;  %v628_v6 = vmul.f32 0.2, %v478_v62  ;;  %vm612_vm9 = vcmp.gt.f32.partialorder %v558_v63, 0.0  ;;  %v487_v8 = vpop.f32.mrf.mxu0  ;;  %v567_v9 = vpop.f32.mrf.mxu1 }
 0x102   : > { %709 = vst.msk [vmem:[%s1154_s11 + $0xd8] sm:$0xff] %vm264_vm0, %v677_v3  ;;  %v644_v7 = vmul.f32 0.2, %v558_v63  ;;  %vm599_vm10 = vcmp.gt.f32.partialorder %v493_v4, 0.0  ;;  %v631_v10 = vmul.f32 0.2, %v493_v4  ;;  %v488_v14 = vadd.f32 %v1145_v36, %v487_v8 }
 0x103   : > { %vm615_vm11 = vcmp.gt.f32.partialorder %v573_v5, 0.0  ;;  %v647_v11 = vmul.f32 0.2, %v573_v5  ;;  %v660_v12 = vsel %vm596_vm8, %v478_v62, %v628_v6  ;;  %v568_v15 = vadd.f32 %v1145_v36, %v567_v9  ;;  %v918_v16 = vpop.f32.mrf.mxu0  ;;  %v942_v17 = vpop.f32.mrf.mxu1 }
 0x104   : > { %v676_v13 = vsel %vm612_vm9, %v558_v63, %v644_v7  ;;  %692 = vst.msk [vmem:[%s1154_s11 + $0x50] sm:$0xff] %vm264_vm0, %v660_v12  ;;  %v663_v18 = vsel %vm599_vm10, %v493_v4, %v631_v10  ;;  %v503_v20 = vadd.f32 %v918_v16, %v1145_v36  ;;  %v583_v21 = vadd.f32 %v942_v17, %v1145_v36 }
 0x105   : > { %708 = vst.msk [vmem:[%s1154_s11 + $0xd0] sm:$0xff] %vm264_vm0, %v676_v13  ;;  %v679_v19 = vsel %vm615_vm11, %v573_v5, %v647_v11  ;;  %695 = vst.msk [vmem:[%s1154_s11 + $0x68] sm:$0xff] %vm264_vm0, %v663_v18  ;;  %vm598_vm12 = vcmp.gt.f32.partialorder %v488_v14, 0.0  ;;  %v630_v22 = vmul.f32 0.2, %v488_v14  ;;  %vm614_vm13 = vcmp.gt.f32.partialorder %v568_v15, 0.0  ;;  %v497_v24 = vpop.f32.mrf.mxu0  ;;  %v577_v25 = vpop.f32.mrf.mxu1 }
 0x106   : > { %711 = vst.msk [vmem:[%s1154_s11 + $0xe8] sm:$0xff] %vm264_vm0, %v679_v19  ;;  %v646_v23 = vmul.f32 0.2, %v568_v15  ;;  %vm601_vm14 = vcmp.gt.f32.partialorder %v503_v20, 0.0  ;;  %v633_v26 = vmul.f32 0.2, %v503_v20  ;;  %v498_v30 = vadd.f32 %v1145_v36, %v497_v24 }
 0x107   : > { %vm617_vm15 = vcmp.gt.f32.partialorder %v583_v21, 0.0  ;;  %v649_v27 = vmul.f32 0.2, %v583_v21  ;;  %v662_v28 = vsel %vm598_vm12, %v488_v14, %v630_v22  ;;  %v578_v31 = vadd.f32 %v1145_v36, %v577_v25 }
 0x108   : > { %v678_v29 = vsel %vm614_vm13, %v568_v15, %v646_v23  ;;  %694 = vst.msk [vmem:[%s1154_s11 + $0x60] sm:$0xff] %vm264_vm0, %v662_v28  ;;  %v665_v32 = vsel %vm601_vm14, %v503_v20, %v633_v26  ;;  %vm600_vm1 = vcmp.gt.f32.partialorder %v498_v30, 0.0  ;;  %v632_v34 = vmul.f32 0.2, %v498_v30 }
 0x109   : > { %710 = vst.msk [vmem:[%s1154_s11 + $0xe0] sm:$0xff] %vm264_vm0, %v678_v29  ;;  %v681_v33 = vsel %vm617_vm15, %v583_v21, %v649_v27  ;;  %697 = vst.msk [vmem:[%s1154_s11 + $0x78] sm:$0xff] %vm264_vm0, %v665_v32  ;;  %vm616_vm2 = vcmp.gt.f32.partialorder %v578_v31, 0.0  ;;  %v648_v35 = vmul.f32 0.2, %v578_v31 }
 0x10a   : > { %713 = vst.msk [vmem:[%s1154_s11 + $0xf8] sm:$0xff] %vm264_vm0, %v681_v33  ;;  %v664_v37 = vsel %vm600_vm1, %v498_v30, %v632_v34 }
 0x10b   : > { %v680_v38 = vsel %vm616_vm2, %v578_v31, %v648_v35  ;;  %696 = vst.msk [vmem:[%s1154_s11 + $0x70] sm:$0xff] %vm264_vm0, %v664_v37 }
 0x10c   : > { %712 = vst.msk [vmem:[%s1154_s11 + $0xf0] sm:$0xff] %vm264_vm0, %v680_v38 }
 0x10d PF: > { %s20_s22 = sadd.s32 1, %s1012_s22   ;;  %s1264_s20 = smov %s1008_s21 }
 0x10e   : > { %p17_p10 = scmp.ge.s32.totalorder %s20_s22, 6   ;;  %s1265_s21 = smov %s1267_s0 }
 0x110   :  { %19 = sbr.rel (!%p17_p10) target bundleno = 17 (0x11), region = 64 }

</bundles_post_ra>
